<compile_context>
chip_gen: v7x
topology: tpu7x:2x2x1
jax: 0.10.0
libtpu: 0.0.40
codegen_flags: <defaults>
</compile_context>

<pallas_src>
import jax
import jax.numpy as jnp
from jax.experimental import pallas as pl
from jax.experimental.pallas import tpu as pltpu


def _round_up(x, m):
    return (x + m - 1) // m * m


def _critic_kernel(s_ref, a_ref, w1s_ref, w1a_ref, b1_ref,
                   w2_ref, b2_ref, w3_ref, b3_ref, o_ref):
    bf16 = jnp.bfloat16

    # ---- Layer 1 (concat fused): h1 = relu(s @ w1_s + a @ w1_a + b1) ----
    h1 = jnp.dot(s_ref[...].astype(bf16), w1s_ref[...],
                 preferred_element_type=jnp.float32)
    h1 = h1 + jnp.dot(a_ref[...].astype(bf16), w1a_ref[...],
                      preferred_element_type=jnp.float32)
    h1 = jnp.maximum(h1 + b1_ref[...], 0.0)                      # f32 VPU

    # ---- Layer 2: h2 = relu(h1 @ w2 + b2) ----
    h2 = jnp.dot(h1.astype(bf16), w2_ref[...],
                 preferred_element_type=jnp.float32)
    h2 = jnp.maximum(h2 + b2_ref[...], 0.0)                      # f32 VPU

    # ---- Layer 3 (H -> 1): VPU multiply + lane reduction, MXU stays free ----
    q = jnp.sum(h2 * w3_ref[...], axis=-1, keepdims=True) + b3_ref[...]
    o_ref[...] = q.astype(o_ref.dtype)


def critic_forward(state, action, params, *, tb=512):
    """Pallas equivalent of Critic.forward(state, action) -> (B, 1)."""
    w1, b1, w2, b2, w3, b3 = params
    B, Ds = state.shape
    Da = action.shape[1]
    H = w1.shape[1]

    bf16 = jnp.bfloat16
    # Split first-layer weight so the concat happens inside the kernel; cast
    # MXU operands to bf16 once here (they are VMEM-resident across the grid).
    w1s = w1[:Ds].astype(bf16)        # (Ds, H)
    w1a = w1[Ds:].astype(bf16)        # (Da, H)
    w2b = w2.astype(bf16)             # (H, H)
    w3_row = w3.reshape(1, H)         # (1, H), stays f32 for the VPU reduce

    # Batch tile: multiple of 8, pads tiny batches up to 8.
    tb = min(tb, _round_up(B, 8))
    Bp = _round_up(B, tb)
    if Bp != B:
        pad = Bp - B
        state = jnp.pad(state, ((0, pad), (0, 0)))
        action = jnp.pad(action, ((0, pad), (0, 0)))

    out = pl.pallas_call(
        _critic_kernel,
        out_shape=jax.ShapeDtypeStruct((Bp, 1), jnp.float32),
        grid=(Bp // tb,),
        in_specs=[
            pl.BlockSpec((tb, Ds), lambda i: (i, 0)),     # state tile
            pl.BlockSpec((tb, Da), lambda i: (i, 0)),     # action tile
            pl.BlockSpec((Ds, H), lambda i: (0, 0)),      # w1_s  (resident)
            pl.BlockSpec((Da, H), lambda i: (0, 0)),      # w1_a  (resident)
            pl.BlockSpec((1, H), lambda i: (0, 0)),       # b1
            pl.BlockSpec((H, H), lambda i: (0, 0)),       # w2    (resident)
            pl.BlockSpec((1, H), lambda i: (0, 0)),       # b2
            pl.BlockSpec((1, H), lambda i: (0, 0)),       # w3 row
            pl.BlockSpec((1, 1), lambda i: (0, 0)),       # b3
        ],
        out_specs=pl.BlockSpec((tb, 1), lambda i: (i, 0)),
        compiler_params=pltpu.CompilerParams(
            dimension_semantics=("parallel",)),
    )(state, action, w1s, w1a, b1, w2b, b2, w3_row, b3)
    return out[:B]


def init_critic_params(key, state_dim, action_dim, hidden_dim=256):
    """Deterministic synthetic init; shapes match torch.nn.Linear layers
    (weights stored transposed: [in, out]; biases as [1, out])."""
    d_in = state_dim + action_dim
    k1, k2, k3, k4, k5, k6 = jax.random.split(key, 6)

    def uniform(k, shape, fan_in):
        bound = 1.0 / jnp.sqrt(jnp.float32(fan_in))
        return jax.random.uniform(k, shape, jnp.float32, -bound, bound)

    w1 = uniform(k1, (d_in, hidden_dim), d_in)
    b1 = uniform(k2, (1, hidden_dim), d_in)
    w2 = uniform(k3, (hidden_dim, hidden_dim), hidden_dim)
    b2 = uniform(k4, (1, hidden_dim), hidden_dim)
    w3 = uniform(k5, (hidden_dim, 1), hidden_dim)
    b3 = uniform(k6, (1, 1), hidden_dim)
    return (w1, b1, w2, b2, w3, b3)


if __name__ == "__main__":
    # Small shapes consistent with the module's forward.
    batch, state_dim, action_dim, hidden_dim = 8, 12, 4, 32

    key = jax.random.PRNGKey(0)
    k_s, k_a, k_p = jax.random.split(key, 3)
    state = jax.random.normal(k_s, (batch, state_dim), jnp.float32)
    action = jax.random.normal(k_a, (batch, action_dim), jnp.float32)
    params = init_critic_params(k_p, state_dim, action_dim, hidden_dim)

    critic_jit = jax.jit(critic_forward)
    q = critic_jit(state, action, params)
    jax.block_until_ready(q)
    assert q.shape == (batch, 1)

    # Reference 1: same math with the same bf16 matmul operands (tight check).
    w1, b1, w2, b2, w3, b3 = params
    bf16 = jnp.bfloat16
    w1s, w1a = w1[:state_dim], w1[state_dim:]
    h1 = (jnp.dot(state.astype(bf16), w1s.astype(bf16),
                  preferred_element_type=jnp.float32)
          + jnp.dot(action.astype(bf16), w1a.astype(bf16),
                    preferred_element_type=jnp.float32) + b1)
    h1 = jnp.maximum(h1, 0.0)
    h2 = jnp.maximum(jnp.dot(h1.astype(bf16), w2.astype(bf16),
                             preferred_element_type=jnp.float32) + b2, 0.0)
    ref_bf16 = jnp.sum(h2 * w3.reshape(1, -1), axis=-1, keepdims=True) + b3
    assert jnp.allclose(q, ref_bf16, atol=2e-3, rtol=2e-3)

    # Reference 2: pure f32 semantics (loose check allowing bf16 rounding).
    x = jnp.concatenate([state, action], axis=1)
    ref = jnp.maximum(x @ w1 + b1, 0.0)
    ref = jnp.maximum(ref @ w2 + b2, 0.0)
    ref = ref @ w3 + b3
    assert jnp.allclose(q, ref, atol=5e-2, rtol=5e-2)

    print("KERNEL_OK")
</pallas_src>

<mosaic_0001>
module attributes {stable_mosaic.version = 11 : i64} {
  func.func @_critic_kernel(%arg0: i32, %arg1: memref<8x12xf32, #tpu.memory_space<vmem>>, %arg2: memref<8x4xf32, #tpu.memory_space<vmem>>, %arg3: memref<12x32xbf16, #tpu.memory_space<vmem>>, %arg4: memref<4x32xbf16, #tpu.memory_space<vmem>>, %arg5: memref<1x32xf32, #tpu.memory_space<vmem>>, %arg6: memref<32x32xbf16, #tpu.memory_space<vmem>>, %arg7: memref<1x32xf32, #tpu.memory_space<vmem>>, %arg8: memref<1x32xf32, #tpu.memory_space<vmem>>, %arg9: memref<1x1xf32, #tpu.memory_space<vmem>>, %arg10: memref<8x1xf32, #tpu.memory_space<vmem>>) attributes {dimension_semantics = [#tpu.dimension_semantics<parallel>], iteration_bounds = array<i64: 1>, scalar_prefetch = 0 : i64, scratch_operands = 0 : i64, tpu.core_type = #tpu.core_type<tc>, window_params = [{transform_indices = @transform_0, window_bounds = array<i64: 8, 12>}, {transform_indices = @transform_1, window_bounds = array<i64: 8, 4>}, {pipeline_mode = #tpu.pipeline_mode<synchronous>, transform_indices = @transform_2, window_bounds = array<i64: 12, 32>}, {pipeline_mode = #tpu.pipeline_mode<synchronous>, transform_indices = @transform_3, window_bounds = array<i64: 4, 32>}, {pipeline_mode = #tpu.pipeline_mode<synchronous>, transform_indices = @transform_4, window_bounds = array<i64: 1, 32>}, {pipeline_mode = #tpu.pipeline_mode<synchronous>, transform_indices = @transform_5, window_bounds = array<i64: 32, 32>}, {pipeline_mode = #tpu.pipeline_mode<synchronous>, transform_indices = @transform_6, window_bounds = array<i64: 1, 32>}, {pipeline_mode = #tpu.pipeline_mode<synchronous>, transform_indices = @transform_7, window_bounds = array<i64: 1, 32>}, {pipeline_mode = #tpu.pipeline_mode<synchronous>, transform_indices = @transform_8, window_bounds = array<i64: 1, 1>}, {transform_indices = @transform_9, window_bounds = array<i64: 8, 1>}]} {
    %c0 = arith.constant 0 : index
    %c0_0 = arith.constant 0 : index
    %0 = vector.load %arg1[%c0, %c0_0] : memref<8x12xf32, #tpu.memory_space<vmem>>, vector<8x12xf32>
    %1 = arith.truncf %0 : vector<8x12xf32> to vector<8x12xbf16>
    %c0_1 = arith.constant 0 : index
    %c0_2 = arith.constant 0 : index
    %2 = vector.load %arg3[%c0_1, %c0_2] : memref<12x32xbf16, #tpu.memory_space<vmem>>, vector<12x32xbf16>
    %cst = arith.constant dense<0.000000e+00> : vector<8x32xf32>
    %3 = tpu.matmul %1, %2, %cst {dimension_numbers = #tpu.dot_dimension_numbers<[1], [0], [0], [1], [0, 0, 1, 1], [], []>} : vector<8x12xbf16>, vector<12x32xbf16>, vector<8x32xf32> -> vector<8x32xf32>
    %c0_3 = arith.constant 0 : index
    %c0_4 = arith.constant 0 : index
    %4 = vector.load %arg2[%c0_3, %c0_4] : memref<8x4xf32, #tpu.memory_space<vmem>>, vector<8x4xf32>
    %5 = arith.truncf %4 : vector<8x4xf32> to vector<8x4xbf16>
    %c0_5 = arith.constant 0 : index
    %c0_6 = arith.constant 0 : index
    %6 = vector.load %arg4[%c0_5, %c0_6] : memref<4x32xbf16, #tpu.memory_space<vmem>>, vector<4x32xbf16>
    %cst_7 = arith.constant dense<0.000000e+00> : vector<8x32xf32>
    %7 = tpu.matmul %5, %6, %cst_7 {dimension_numbers = #tpu.dot_dimension_numbers<[1], [0], [0], [1], [0, 0, 1, 1], [], []>} : vector<8x4xbf16>, vector<4x32xbf16>, vector<8x32xf32> -> vector<8x32xf32>
    %8 = arith.addf %3, %7 : vector<8x32xf32>
    %c0_8 = arith.constant 0 : index
    %c0_9 = arith.constant 0 : index
    %9 = vector.load %arg5[%c0_8, %c0_9] : memref<1x32xf32, #tpu.memory_space<vmem>>, vector<1x32xf32>
    %10 = vector.broadcast %9 : vector<1x32xf32> to vector<8x32xf32>
    %11 = arith.addf %8, %10 : vector<8x32xf32>
    %cst_10 = arith.constant 0.000000e+00 : f32
    %12 = vector.broadcast %cst_10 : f32 to vector<8x32xf32>
    %13 = arith.maximumf %11, %12 : vector<8x32xf32>
    %14 = arith.truncf %13 : vector<8x32xf32> to vector<8x32xbf16>
    %c0_11 = arith.constant 0 : index
    %c0_12 = arith.constant 0 : index
    %15 = vector.load %arg6[%c0_11, %c0_12] : memref<32x32xbf16, #tpu.memory_space<vmem>>, vector<32x32xbf16>
    %cst_13 = arith.constant dense<0.000000e+00> : vector<8x32xf32>
    %16 = tpu.matmul %14, %15, %cst_13 {dimension_numbers = #tpu.dot_dimension_numbers<[1], [0], [0], [1], [0, 0, 1, 1], [], []>} : vector<8x32xbf16>, vector<32x32xbf16>, vector<8x32xf32> -> vector<8x32xf32>
    %c0_14 = arith.constant 0 : index
    %c0_15 = arith.constant 0 : index
    %17 = vector.load %arg7[%c0_14, %c0_15] : memref<1x32xf32, #tpu.memory_space<vmem>>, vector<1x32xf32>
    %18 = vector.broadcast %17 : vector<1x32xf32> to vector<8x32xf32>
    %19 = arith.addf %16, %18 : vector<8x32xf32>
    %cst_16 = arith.constant 0.000000e+00 : f32
    %20 = vector.broadcast %cst_16 : f32 to vector<8x32xf32>
    %21 = arith.maximumf %19, %20 : vector<8x32xf32>
    %c0_17 = arith.constant 0 : index
    %c0_18 = arith.constant 0 : index
    %22 = vector.load %arg8[%c0_17, %c0_18] : memref<1x32xf32, #tpu.memory_space<vmem>>, vector<1x32xf32>
    %23 = vector.broadcast %22 : vector<1x32xf32> to vector<8x32xf32>
    %24 = arith.mulf %21, %23 : vector<8x32xf32>
    %cst_19 = arith.constant dense<0.000000e+00> : vector<8xf32>
    %25 = vector.multi_reduction <add>, %24, %cst_19 [1] : vector<8x32xf32> to vector<8xf32>
    %26 = vector.shape_cast %25 : vector<8xf32> to vector<8x1xf32>
    %c0_20 = arith.constant 0 : index
    %c0_21 = arith.constant 0 : index
    %27 = vector.load %arg9[%c0_20, %c0_21] : memref<1x1xf32, #tpu.memory_space<vmem>>, vector<1x1xf32>
    %28 = vector.broadcast %27 : vector<1x1xf32> to vector<8x1xf32>
    %29 = arith.addf %26, %28 : vector<8x1xf32>
    %c0_22 = arith.constant 0 : index
    %c0_23 = arith.constant 0 : index
    %30 = vector.load %arg10[%c0_22, %c0_23] : memref<8x1xf32, #tpu.memory_space<vmem>>, vector<8x1xf32>
    tpu.vector_store %arg10[%c0_22, %c0_23], %29 {strides = array<i32>} : memref<8x1xf32, #tpu.memory_space<vmem>>, vector<8x1xf32>,
    return
  }
  func.func @transform_0(%arg0: i32) -> (i32, i32) {
    %c0_i32 = arith.constant 0 : i32
    %c0_i32_0 = arith.constant 0 : i32
    return %arg0, %c0_i32 : i32, i32
  }
  func.func @transform_1(%arg0: i32) -> (i32, i32) {
    %c0_i32 = arith.constant 0 : i32
    %c0_i32_0 = arith.constant 0 : i32
    return %arg0, %c0_i32 : i32, i32
  }
  func.func @transform_2(%arg0: i32) -> (i32, i32) {
    %c0_i32 = arith.constant 0 : i32
    %c0_i32_0 = arith.constant 0 : i32
    %c0_i32_1 = arith.constant 0 : i32
    return %c0_i32, %c0_i32_0 : i32, i32
  }
  func.func @transform_3(%arg0: i32) -> (i32, i32) {
    %c0_i32 = arith.constant 0 : i32
    %c0_i32_0 = arith.constant 0 : i32
    %c0_i32_1 = arith.constant 0 : i32
    return %c0_i32, %c0_i32_0 : i32, i32
  }
  func.func @transform_4(%arg0: i32) -> (i32, i32) {
    %c0_i32 = arith.constant 0 : i32
    %c0_i32_0 = arith.constant 0 : i32
    %c0_i32_1 = arith.constant 0 : i32
    return %c0_i32, %c0_i32_0 : i32, i32
  }
  func.func @transform_5(%arg0: i32) -> (i32, i32) {
    %c0_i32 = arith.constant 0 : i32
    %c0_i32_0 = arith.constant 0 : i32
    %c0_i32_1 = arith.constant 0 : i32
    return %c0_i32, %c0_i32_0 : i32, i32
  }
  func.func @transform_6(%arg0: i32) -> (i32, i32) {
    %c0_i32 = arith.constant 0 : i32
    %c0_i32_0 = arith.constant 0 : i32
    %c0_i32_1 = arith.constant 0 : i32
    return %c0_i32, %c0_i32_0 : i32, i32
  }
  func.func @transform_7(%arg0: i32) -> (i32, i32) {
    %c0_i32 = arith.constant 0 : i32
    %c0_i32_0 = arith.constant 0 : i32
    %c0_i32_1 = arith.constant 0 : i32
    return %c0_i32, %c0_i32_0 : i32, i32
  }
  func.func @transform_8(%arg0: i32) -> (i32, i32) {
    %c0_i32 = arith.constant 0 : i32
    %c0_i32_0 = arith.constant 0 : i32
    %c0_i32_1 = arith.constant 0 : i32
    return %c0_i32, %c0_i32_0 : i32, i32
  }
  func.func @transform_9(%arg0: i32) -> (i32, i32) {
    %c0_i32 = arith.constant 0 : i32
    %c0_i32_0 = arith.constant 0 : i32
    return %arg0, %c0_i32 : i32, i32
  }
}

</mosaic_0001>

<bundles_post_ra>
// kernel: critic_forward.1
= control target key start
LH: loop header
LB: loop body
LE: loop exit
PB: predicated region body
PF: predicated region fallthrough
CT: control target
= control target key end

     0   :  { %vm46_vm0 = vcmask 1041408   ;;  %vm99_vm1 = vcmask 1045504   ;;  %v288_v0 = vmov 0.0   ;;  %vm289_vm2 = vmmov 0   ;;  %s376_s3 = inlined_call_operand.vmem [shape: bf16[4,32], index: 3, kind: input, shape index: {}]   ;;  %s377_s2 = inlined_call_operand.vmem [shape: bf16[12,32], index: 2, kind: input, shape index: {}]   ;;  %s378_s1 = inlined_call_operand.vmem [shape: f32[8,4], index: 1, kind: input, shape index: {}]   ;;  %s379_s0 = inlined_call_operand.vmem [shape: f32[8,12], index: 0, kind: input, shape index: {}]   ;;  %s380_s5 = inlined_call_operand.vmem [shape: bf16[32,32], index: 5, kind: input, shape index: {}]   ;;  %s381_s4 = inlined_call_operand.vmem [shape: f32[1,32], index: 4, kind: input, shape index: {}]   ;;  %s382_s8 = inlined_call_operand.<no memory space> [shape: f32[1,1], index: 8, kind: input, shape index: {}]   ;;  %s383_s6 = inlined_call_operand.vmem [shape: f32[1,32], index: 6, kind: input, shape index: {}]   ;;  %s384_s7 = inlined_call_operand.vmem [shape: f32[1,32], index: 7, kind: input, shape index: {}]   ;;  %s385_s9 = inlined_call_operand.vmem [shape: f32[8,1], index: 9, kind: output, shape index: {}]  }
   0x1   :  { %263 = vmatprep.subr.bf16.mxu0 %v288_v0  ;;  %v41_v1 = vld [vmem:[%s376_s3] sm:$0x3]  ;;  %269 = vmatprep.subr.bf16.mxu1 %v288_v0  ;;  %vm42_vm3 = vcmask 31744   ;;  %vm95_vm4 = vcmask 97280   ;;  %v287_v10 = vld [vmem:[%s380_s5 + $0x8] sm:$0xff]   ;;  %vm176_vm5 = vcmask 261120   ;;  %v14_v24 = vstv %s382_s8 }
   0x2   :  { %v48_v2 = vsel %vm46_vm0, %v41_v1, 0  ;;  %265 = vmatprep.mubr.msk.bf16.mxu0 %vm289_vm2, %v288_v0  ;;  %v285_v3 = vld [vmem:[%s377_s2] sm:$0x3f]   ;;  %271 = vmatprep.mubr.msk.bf16.mxu1 %vm289_vm2, %v288_v0  ;;  %15 = vst [vmem:[#allocation2] sm:$0x1] %v14_v24  ;;  %vm240_vm6 = vcmask 7168  }
   0x3   :  { %v39_v4 = vld [vmem:[%s378_s1] sm:$0xff]  ;;  %264 = vmatpush3.bf16.msra.mxu0 %v48_v2  ;;  %v101_v7 = vsel %vm99_vm1, %v285_v3, 0 }
   0x4   :  { %v35_v5 = vld [vmem:[%s379_s0] sm:$0xff]  ;;  %v40_v6 = vpack.c.bf16 %v39_v4, %v39_v4  ;;  %275 = vmatprep.subr.bf16.mxu0 %v288_v0  ;;  %270 = vmatpush3.bf16.msra.mxu1 %v101_v7 }
   0x5   :  { %v36_v8 = vpack.c.bf16 %v35_v5, %v35_v5  ;;  %v286_v9 = vld [vmem:[%s380_s5] sm:$0xff]  }
   0x6   :  { %266 = vmatmul.mubr.msk.bf16.vlgmr.msra.gmra.mrb[0].mxu0 %vm42_vm3, %v40_v6  ;;  %v249_v15 = vld [vmem:[%s381_s4] ss:$0 sm:$0xff] }
   0x7   :  { %279 = vmatprep.mubr.msk.bf16.mxu0 %vm289_vm2, %v288_v0  ;;  %272 = vmatmul.mubr.msk.bf16.vlgmr.msra.gmra.mrb[0].mxu1 %vm95_vm4, %v36_v8  ;;  %v250_v25 = vld [vmem:[%s383_s6] ss:$0 sm:$0xff] }
   0x8   :  { %276 = vmatpush3.bf16.msra.mxu0 %v286_v9  ;;  %v254_v30 = vld [vmem:[%s384_s7] ss:$0 sm:$0xff] }
   0x9   :  { %277 = vmatprep.subr.bf16.mxu0 %v288_v0  ;;  %v255_v35 = vld [vmem:[#allocation2] ss:$0 sm:$0xff] }
   0xc   :  { %278 = vmatpush3.bf16.msra.mxu0 %v287_v10 }
  0xd9   :  { %v84_v11 = vpop.f32.mrb[0].mxu0 }
  0xda   :  { %v267_v12 = vpop.f32.mrb[1].mxu0  ;;  %v137_v14 = vpop.f32.mrb[0].mxu1 }
  0xdb   :  { %v87_v13 = vpop.f32.mrb[2].mxu0  ;;  %v138_v16 = vadd.f32 %v137_v14, %v84_v11  ;;  %v273_v18 = vpop.f32.mrb[1].mxu1 }
  0xdc   :  { %v268_v17 = vpop.f32.mrb[3].mxu0  ;;  %v140_v19 = vpop.f32.mrb[2].mxu1 }
  0xdd   :  { %v150_v20 = vadd.f32 %v249_v15, %v138_v16  ;;  %v274_v21 = vpop.f32.mrb[3].mxu1 }
  0xdf   :  { %v151_v22 = vmax.f32 %v150_v20, 0.0 }
  0xe1   :  { %v152_v23 = vpack.c.bf16 %v151_v22, %v151_v22 }
  0xe3   :  { %280 = vmatmul.mubr.msk.bf16.vlgmr.msra.gmra.mrb[4].mxu0 %vm176_vm5, %v152_v23 }
 0x1b6   :  { %v214_v26 = vpop.f32.mrb[4].mxu0 }
 0x1b7   :  { %v215_v27 = vadd.f32 %v250_v25, %v214_v26  ;;  %v281_v28 = vpop.f32.mrb[5].mxu0 }
 0x1b8   :  { %v217_v29 = vpop.f32.mrb[6].mxu0 }
 0x1b9   :  { %v220_v31 = vmax.f32 %v215_v27, 0.0  ;;  %v282_v32 = vpop.f32.mrb[7].mxu0 }
 0x1bb   :  { %v228_v33 = vmul.f32 %v254_v30, %v220_v31 }
 0x1bd   :  { %v229_v34 = vsel %vm176_vm5, %v228_v33, 0.0 }
 0x1be   :  { %230 = vadd.xlane.f32.xlu0 %v229_v34 }
 0x24b   :  { %v231_v36 = vpop.xlane.xlu0 %230 }
 0x24c   :  { %v239_v37 = vadd.f32 %v255_v35, %v231_v36 }
 0x24e   :  { %241 = vst.msk [vmem:[%s385_s9] sm:$0xff] %vm240_vm6, %v239_v37 }

</bundles_post_ra>
